<compile_context>
chip_gen: v7x
topology: tpu7x:2x2x1
jax: 0.10.0
libtpu: 0.0.40
codegen_flags: <defaults>
</compile_context>

<pallas_src>
import math
from types import SimpleNamespace

import jax
import jax.numpy as jnp
from jax.experimental import pallas as pl
from jax.experimental.pallas import tpu as pltpu

_LOG_EPS = math.log(1e-4)
_LOG_ONE_MINUS_EPS = math.log(1.0 - 1e-4)


# ---------------------------------------------------------------------------
# Kernel 1: CornerNet/CenterNet focal loss on the heatmap.
# One grid step = one (layer, row-tile) block of the (L, B*C, H*W) heatmap.
# Emits per-block partial sums [pos_loss, neg_loss, num_pos] into a lane-dense
# (1, 128) row; the final reduction happens in JAX.
# ---------------------------------------------------------------------------
def _focal_partial_kernel(logits_ref, gt_ref, out_ref):
    x = logits_ref[0].astype(jnp.float32)     # (TM, HW), bf16 storage -> f32 math
    gt = gt_ref[0]                            # (TM, HW), f32 (exact ==1 / (1-gt)^4)

    # log-sigmoid identities:  log(sigmoid(x)) = -softplus(-x)
    #                          log(1-sigmoid(x)) = -softplus(x)
    # One exp + one log serve both branches.
    t = jnp.exp(-jnp.abs(x))
    log1p_t = jnp.log(1.0 + t)
    sp_neg = jnp.maximum(-x, 0.0) + log1p_t   # softplus(-x) = -log(sigmoid(x))
    sp_pos = jnp.maximum(x, 0.0) + log1p_t    # softplus(x)  = -log(1-sigmoid(x))

    # _sigmoid clamps sigmoid(x) to [1e-4, 1-1e-4]; clamp the log terms to the
    # equivalent range.  exp(clamped log) then IS the clamped sigmoid.
    log_pred = jnp.clip(-sp_neg, _LOG_EPS, _LOG_ONE_MINUS_EPS)
    log_not_pred = jnp.clip(-sp_pos, _LOG_EPS, _LOG_ONE_MINUS_EPS)
    pred = jnp.exp(log_pred)                  # = clamp(sigmoid(x), 1e-4, 1-1e-4)

    pos = (gt == 1.0).astype(jnp.float32)
    neg_weights = (1.0 - gt) ** 4

    pos_loss = log_pred * (1.0 - pred) ** 2 * pos
    neg_loss = log_not_pred * pred * pred * neg_weights * (1.0 - pos)

    pos_sum = jnp.sum(pos_loss)
    neg_sum = jnp.sum(neg_loss)
    num_pos = jnp.sum(pos)

    lane = jax.lax.broadcasted_iota(jnp.int32, (1, 128), 1)
    row = (jnp.where(lane == 0, pos_sum, 0.0)
           + jnp.where(lane == 1, neg_sum, 0.0)
           + jnp.where(lane == 2, num_pos, 0.0))
    out_ref[0, 0] = row


def _pick_tile_rows(rows, bytes_per_row, target_block_bytes=3 << 20):
    """Largest row-tile that divides `rows`, is a multiple of 8 (or the whole
    extent), and keeps the combined (logits + gt) block under
    ~target_block_bytes."""
    max_tm = max(8, target_block_bytes // max(1, bytes_per_row))
    if rows <= max_tm:
        return rows
    best = 0
    tm = 8
    while tm <= max_tm:
        if rows % tm == 0:
            best = tm
        tm += 8
    if best == 0:
        # TODO(synk): pad the row axis to a multiple of 8 instead of falling
        # back to a single (possibly oversized) block.
        return rows
    return best


def focal_loss_hm(hm_logits, gt_hm):
    """hm_logits, gt_hm: (L, B, C, H, W).  Returns per-layer focal loss (L,)."""
    L, B, C, H, W = hm_logits.shape
    rows, hw = B * C, H * W

    # bf16 logits cut the dominant HBM read; gt stays f32 (exact semantics).
    x = hm_logits.reshape(L, rows, hw).astype(jnp.bfloat16)
    g = gt_hm.reshape(L, rows, hw).astype(jnp.float32)

    bytes_per_row = hw * (2 + 4)              # bf16 logits + f32 gt
    tm = _pick_tile_rows(rows, bytes_per_row)
    nt = rows // tm
    block_bytes = tm * bytes_per_row
    # double-buffered inputs ~= 2 * block_bytes; leave slack, cap at 64 MiB.
    vmem_limit = int(min(64 * 2**20, max(8 * 2**20, 3 * block_bytes)))

    partials = pl.pallas_call(
        _focal_partial_kernel,
        out_shape=jax.ShapeDtypeStruct((L, nt, 1, 128), jnp.float32),
        grid=(L, nt),
        in_specs=[
            pl.BlockSpec((1, tm, hw), lambda l, t: (l, t, 0)),
            pl.BlockSpec((1, tm, hw), lambda l, t: (l, t, 0)),
        ],
        out_specs=pl.BlockSpec((1, 1, 1, 128), lambda l, t: (l, t, 0, 0)),
        compiler_params=pltpu.CompilerParams(
            dimension_semantics=("parallel", "parallel"),
            vmem_limit_bytes=vmem_limit,
        ),
    )(x, g)

    sums = partials[:, :, 0, :3].sum(axis=1)          # (L, 3)
    pos_sum, neg_sum, num_pos = sums[:, 0], sums[:, 1], sums[:, 2]
    # torch: if num_pos == 0: loss = -neg_loss else -(pos + neg) / num_pos
    return jnp.where(num_pos > 0.0,
                     -(pos_sum + neg_sum) / jnp.maximum(num_pos, 1.0),
                     -neg_sum)


# ---------------------------------------------------------------------------
# Kernel 2: _transpose_and_gather_feat + masked SmoothL1, fused over all
# heads (reg|fourier|rmax concatenated on the channel axis) and all layers.
# One grid step = one (layer, batch).  Gather is a one-hot (K,HW) MXU matmul
# against the native (C, HW) layout.
# ---------------------------------------------------------------------------
def _gather_smoothl1_kernel(ind_ref, feat_ref, mask_ref, tgt_ref, out_ref):
    # ind  (1, K, 1) i32 | feat (1, C, HW) f32 | mask (1, K, 1) f32
    # tgt  (1, K, C) f32 | out  (1, 1, C)  f32  (per-channel SmoothL1 sums)
    k = ind_ref.shape[1]
    hw = feat_ref.shape[2]

    idx = ind_ref[0]                                  # (K, 1) int32
    feat = feat_ref[0].astype(jnp.float32)            # (C, HW)
    mask = mask_ref[0].astype(jnp.float32)            # (K, 1)
    tgt = tgt_ref[0].astype(jnp.float32)              # (K, C)

    # One-hot gather on the MXU: pred[k, c] = feat[c, ind[k]].
    # Out-of-range indices produce an all-zero row (no OOB VMEM access).
    lane = jax.lax.broadcasted_iota(jnp.int32, (k, hw), 1)
    onehot = (lane == idx).astype(jnp.float32)        # (K, HW)
    pred = jnp.einsum("kh,ch->kc", onehot, feat,
                      preferred_element_type=jnp.float32)   # (K, C)

    # F.smooth_l1_loss(pred*mask, tgt*mask, beta=1, reduction='sum'), kept as
    # per-channel sums so per-head normalization can happen in JAX.
    d = (pred - tgt) * mask
    ad = jnp.abs(d)
    l = jnp.where(ad < 1.0, 0.5 * d * d, ad - 0.5)
    out_ref[0] = jnp.sum(l, axis=0, keepdims=True)    # (1, C)


def fused_regression_losses(outputs, batches, head_specs):
    """Gather + masked SmoothL1 for all heads and all layers in one kernel.

    head_specs: list of (head_name, n_channels).  Returns {head: (L,) losses}.
    Assumes all layers share spatial size / K (true for this model).
    """
    L = len(outputs)
    B, _, H, W = outputs[0][head_specs[0][0]].shape
    HW = H * W
    K = batches[0]["ind"].shape[1]
    C_total = sum(c for _, c in head_specs)

    feat_layers, tgt_layers = [], []
    for output, batch in zip(outputs, batches):
        feat_layers.append(jnp.concatenate(
            [output[name].reshape(B, c, HW) for name, c in head_specs], axis=1))
        tgt_layers.append(jnp.concatenate(
            [batch[name] for name, _ in head_specs], axis=-1))

    feat = jnp.stack(feat_layers).reshape(L * B, C_total, HW).astype(jnp.float32)
    tgt = jnp.stack(tgt_layers).reshape(L * B, K, C_total).astype(jnp.float32)
    ind = jnp.stack([b["ind"] for b in batches]).astype(jnp.int32).reshape(L * B, K, 1)
    mask = jnp.stack([b["reg_mask"] for b in batches]).astype(jnp.float32)   # (L,B,K)

    chan_sums = pl.pallas_call(
        _gather_smoothl1_kernel,
        out_shape=jax.ShapeDtypeStruct((L * B, 1, C_total), jnp.float32),
        grid=(L * B,),
        in_specs=[
            pl.BlockSpec((1, K, 1), lambda i: (i, 0, 0)),           # ind
            pl.BlockSpec((1, C_total, HW), lambda i: (i, 0, 0)),    # feat
            pl.BlockSpec((1, K, 1), lambda i: (i, 0, 0)),           # mask
            pl.BlockSpec((1, K, C_total), lambda i: (i, 0, 0)),     # targets
        ],
        out_specs=pl.BlockSpec((1, 1, C_total), lambda i: (i, 0, 0)),
        compiler_params=pltpu.CompilerParams(
            dimension_semantics=("parallel",)),
    )(ind, feat, mask.reshape(L * B, K, 1), tgt)

    chan_sums = chan_sums.reshape(L, B, C_total).sum(axis=1)        # (L, C_total)
    mask_sum = mask.sum(axis=(1, 2))                                # (L,)

    losses, off = {}, 0
    for name, c in head_specs:
        head_sum = chan_sums[:, off:off + c].sum(axis=-1)           # (L,)
        # denominator = mask expanded over the head's channels, summed
        losses[name] = head_sum / (mask_sum * float(c) + 1e-4)
        off += c
    return losses


# ---------------------------------------------------------------------------
# ContourDet_loss forward
# ---------------------------------------------------------------------------
def contourdet_loss(outputs, batches, cfg):
    num_layer = len(outputs)

    # All layers share shapes in this model, so the heatmap focal loss and the
    # three regression heads are each computed with a single fused pallas_call.
    hm_per_layer = focal_loss_hm(
        jnp.stack([o["hm"] for o in outputs]),
        jnp.stack([b["hm"] for b in batches]))
    hm_loss = hm_per_layer.sum()

    head_specs = [("reg", outputs[0]["reg"].shape[1]),
                  ("fourier", outputs[0]["fourier"].shape[1]),
                  ("rmax", outputs[0]["rmax"].shape[1])]
    # TODO(synk): exact FourierLoss_rmax(cfg) definition unavailable; the
    # 'fourier' head uses the same gather + masked SmoothL1 as 'reg'/'rmax'.
    reg_losses = fused_regression_losses(outputs, batches, head_specs)
    reg_loss = reg_losses["reg"].sum()
    fourier_loss = reg_losses["fourier"].sum()
    rmax_loss = reg_losses["rmax"].sum()

    scalar_status = {
        "hm_loss": hm_loss / num_layer,
        "reg_loss": reg_loss / num_layer,
        "fourier_loss": fourier_loss / num_layer,
        "rmax_loss": rmax_loss / num_layer,
    }
    loss = (cfg.model.loss.hm_weight * scalar_status["hm_loss"]
            + cfg.model.loss.fd_weight * scalar_status["fourier_loss"]
            + cfg.model.loss.reg_weight * scalar_status["reg_loss"]
            + cfg.model.loss.rmax_weight * scalar_status["rmax_loss"])
    scalar_status["loss"] = loss
    return loss, scalar_status


# ---------------------------------------------------------------------------
# Demo
# ---------------------------------------------------------------------------
if __name__ == "__main__":
    B, C_HM, H, W = 2, 4, 16, 16      # heatmap: num classes = 4
    C_REG, C_FOURIER, C_RMAX = 2, 8, 1
    K = 8                             # max objects per image
    NUM_LAYERS = 2

    cfg = SimpleNamespace(model=SimpleNamespace(loss=SimpleNamespace(
        hm_weight=1.0, reg_weight=1.0, fd_weight=0.1, rmax_weight=0.5)))

    key = jax.random.PRNGKey(0)
    outputs, batches = [], []
    for layer in range(NUM_LAYERS):
        keys = jax.random.split(jax.random.fold_in(key, layer), 10)

        output = {
            'hm': jax.random.normal(keys[0], (B, C_HM, H, W), jnp.float32),
            'reg': jax.random.normal(keys[1], (B, C_REG, H, W), jnp.float32),
            'fourier': jax.random.normal(keys[2], (B, C_FOURIER, H, W), jnp.float32),
            'rmax': jax.random.normal(keys[3], (B, C_RMAX, H, W), jnp.float32),
        }

        gt_hm = jax.random.uniform(keys[4], (B, C_HM, H, W), jnp.float32,
                                   minval=0.0, maxval=0.95)
        # plant some exact-1 peaks so the positive branch of the focal loss fires
        gt_hm = gt_hm.at[:, 0, 3, 5].set(1.0).at[:, 1, 10, 12].set(1.0)

        ind = jax.random.randint(keys[5], (B, K), 0, H * W, jnp.int32)
        reg_mask = (jax.random.uniform(keys[6], (B, K)) > 0.3).astype(jnp.float32)

        batch = {
            'hm': gt_hm,
            'ind': ind,
            'reg_mask': reg_mask,
            'reg': jax.random.normal(keys[7], (B, K, C_REG), jnp.float32),
            'fourier': jax.random.normal(keys[8], (B, K, C_FOURIER), jnp.float32),
            'rmax': jax.random.normal(keys[9], (B, K, C_RMAX), jnp.float32),
        }
        outputs.append(output)
        batches.append(batch)

    loss, status = contourdet_loss(outputs, batches, cfg)
    jax.block_until_ready(loss)
    for v in status.values():
        jax.block_until_ready(v)
    print("KERNEL_OK")
</pallas_src>

<mosaic_0001>
module attributes {stable_mosaic.version = 11 : i64} {
  func.func @_focal_partial_kernel(%arg0: i32, %arg1: i32, %arg2: memref<1x8x256xbf16, #tpu.memory_space<vmem>>, %arg3: memref<1x8x256xf32, #tpu.memory_space<vmem>>, %arg4: memref<1x1x1x128xf32, #tpu.memory_space<vmem>>) attributes {dimension_semantics = [#tpu.dimension_semantics<parallel>, #tpu.dimension_semantics<parallel>], iteration_bounds = array<i64: 2, 1>, scalar_prefetch = 0 : i64, scratch_operands = 0 : i64, tpu.core_type = #tpu.core_type<tc>, window_params = [{transform_indices = @transform_0, window_bounds = array<i64: 1, 8, 256>}, {transform_indices = @transform_1, window_bounds = array<i64: 1, 8, 256>}, {transform_indices = @transform_2, window_bounds = array<i64: 1, 1, 1, 128>}]} {
    %c0 = arith.constant 0 : index
    %c0_0 = arith.constant 0 : index
    %c0_1 = arith.constant 0 : index
    %0 = vector.load %arg2[%c0, %c0_0, %c0_1] : memref<1x8x256xbf16, #tpu.memory_space<vmem>>, vector<1x8x256xbf16>
    %1 = vector.shape_cast %0 : vector<1x8x256xbf16> to vector<8x256xbf16>
    %2 = arith.extf %1 : vector<8x256xbf16> to vector<8x256xf32>
    %c0_2 = arith.constant 0 : index
    %c0_3 = arith.constant 0 : index
    %c0_4 = arith.constant 0 : index
    %3 = vector.load %arg3[%c0_2, %c0_3, %c0_4] : memref<1x8x256xf32, #tpu.memory_space<vmem>>, vector<1x8x256xf32>
    %4 = vector.shape_cast %3 : vector<1x8x256xf32> to vector<8x256xf32>
    %5 = math.absf %2 : vector<8x256xf32>
    %cst = arith.constant 0.000000e+00 : f32
    %6 = vector.broadcast %cst : f32 to vector<8x256xf32>
    %7 = arith.subf %6, %5 : vector<8x256xf32>
    %8 = math.exp %7 : vector<8x256xf32>
    %cst_5 = arith.constant 1.000000e+00 : f32
    %9 = vector.broadcast %cst_5 : f32 to vector<8x256xf32>
    %10 = arith.addf %9, %8 : vector<8x256xf32>
    %11 = math.log %10 : vector<8x256xf32>
    %cst_6 = arith.constant 0.000000e+00 : f32
    %12 = vector.broadcast %cst_6 : f32 to vector<8x256xf32>
    %13 = arith.subf %12, %2 : vector<8x256xf32>
    %cst_7 = arith.constant 0.000000e+00 : f32
    %14 = vector.broadcast %cst_7 : f32 to vector<8x256xf32>
    %15 = arith.maximumf %13, %14 : vector<8x256xf32>
    %16 = arith.addf %15, %11 : vector<8x256xf32>
    %cst_8 = arith.constant 0.000000e+00 : f32
    %17 = vector.broadcast %cst_8 : f32 to vector<8x256xf32>
    %18 = arith.maximumf %2, %17 : vector<8x256xf32>
    %19 = arith.addf %18, %11 : vector<8x256xf32>
    %cst_9 = arith.constant 0.000000e+00 : f32
    %20 = vector.broadcast %cst_9 : f32 to vector<8x256xf32>
    %21 = arith.subf %20, %16 : vector<8x256xf32>
    %cst_10 = arith.constant -9.21034049 : f32
    %cst_11 = arith.constant -1.000050e-04 : f32
    %22 = vector.broadcast %cst_10 : f32 to vector<8x256xf32>
    %23 = arith.maximumf %22, %21 : vector<8x256xf32>
    %24 = vector.broadcast %cst_11 : f32 to vector<8x256xf32>
    %25 = arith.minimumf %24, %23 : vector<8x256xf32>
    %cst_12 = arith.constant 0.000000e+00 : f32
    %26 = vector.broadcast %cst_12 : f32 to vector<8x256xf32>
    %27 = arith.subf %26, %19 : vector<8x256xf32>
    %cst_13 = arith.constant -9.21034049 : f32
    %cst_14 = arith.constant -1.000050e-04 : f32
    %28 = vector.broadcast %cst_13 : f32 to vector<8x256xf32>
    %29 = arith.maximumf %28, %27 : vector<8x256xf32>
    %30 = vector.broadcast %cst_14 : f32 to vector<8x256xf32>
    %31 = arith.minimumf %30, %29 : vector<8x256xf32>
    %32 = math.exp %25 : vector<8x256xf32>
    %cst_15 = arith.constant 1.000000e+00 : f32
    %33 = vector.broadcast %cst_15 : f32 to vector<8x256xf32>
    %34 = arith.cmpf oeq, %4, %33 : vector<8x256xf32>
    %35 = arith.extui %34 : vector<8x256xi1> to vector<8x256xi32>
    %36 = arith.sitofp %35 : vector<8x256xi32> to vector<8x256xf32>
    %cst_16 = arith.constant 1.000000e+00 : f32
    %37 = vector.broadcast %cst_16 : f32 to vector<8x256xf32>
    %38 = arith.subf %37, %4 : vector<8x256xf32>
    %39 = arith.mulf %38, %38 : vector<8x256xf32>
    %40 = arith.mulf %39, %39 : vector<8x256xf32>
    %cst_17 = arith.constant 1.000000e+00 : f32
    %41 = vector.broadcast %cst_17 : f32 to vector<8x256xf32>
    %42 = arith.subf %41, %32 : vector<8x256xf32>
    %43 = arith.mulf %42, %42 : vector<8x256xf32>
    %44 = arith.mulf %25, %43 : vector<8x256xf32>
    %45 = arith.mulf %44, %36 : vector<8x256xf32>
    %46 = arith.mulf %31, %32 : vector<8x256xf32>
    %47 = arith.mulf %46, %32 : vector<8x256xf32>
    %48 = arith.mulf %47, %40 : vector<8x256xf32>
    %cst_18 = arith.constant 1.000000e+00 : f32
    %49 = vector.broadcast %cst_18 : f32 to vector<8x256xf32>
    %50 = arith.subf %49, %36 : vector<8x256xf32>
    %51 = arith.mulf %48, %50 : vector<8x256xf32>
    %52 = vector.shape_cast %45 : vector<8x256xf32> to vector<1x8x256xf32>
    %cst_19 = arith.constant dense<0.000000e+00> : vector<1xf32>
    %53 = vector.multi_reduction <add>, %52, %cst_19 [1, 2] : vector<1x8x256xf32> to vector<1xf32>
    %54 = vector.shape_cast %53 : vector<1xf32> to vector<1x1x1xf32>
    %55 = vector.extract %54[0, 0, 0] : f32 from vector<1x1x1xf32>
    %56 = vector.shape_cast %51 : vector<8x256xf32> to vector<1x8x256xf32>
    %cst_20 = arith.constant dense<0.000000e+00> : vector<1xf32>
    %57 = vector.multi_reduction <add>, %56, %cst_20 [1, 2] : vector<1x8x256xf32> to vector<1xf32>
    %58 = vector.shape_cast %57 : vector<1xf32> to vector<1x1x1xf32>
    %59 = vector.extract %58[0, 0, 0] : f32 from vector<1x1x1xf32>
    %60 = vector.shape_cast %36 : vector<8x256xf32> to vector<1x8x256xf32>
    %cst_21 = arith.constant dense<0.000000e+00> : vector<1xf32>
    %61 = vector.multi_reduction <add>, %60, %cst_21 [1, 2] : vector<1x8x256xf32> to vector<1xf32>
    %62 = vector.shape_cast %61 : vector<1xf32> to vector<1x1x1xf32>
    %63 = vector.extract %62[0, 0, 0] : f32 from vector<1x1x1xf32>
    %64 = tpu.iota {dimensions = array<i32: 1>} : vector<1x128xi32>
    %c0_i32 = arith.constant 0 : i32
    %65 = vector.broadcast %c0_i32 : i32 to vector<1x128xi32>
    %66 = arith.cmpi eq, %64, %65 : vector<1x128xi32>
    %cst_22 = arith.constant 0.000000e+00 : f32
    %67 = vector.broadcast %55 : f32 to vector<1x128xf32>
    %68 = vector.broadcast %cst_22 : f32 to vector<1x128xf32>
    %69 = arith.select %66, %67, %68 : vector<1x128xi1>, vector<1x128xf32>
    %c1_i32 = arith.constant 1 : i32
    %70 = vector.broadcast %c1_i32 : i32 to vector<1x128xi32>
    %71 = arith.cmpi eq, %64, %70 : vector<1x128xi32>
    %cst_23 = arith.constant 0.000000e+00 : f32
    %72 = vector.broadcast %59 : f32 to vector<1x128xf32>
    %73 = vector.broadcast %cst_23 : f32 to vector<1x128xf32>
    %74 = arith.select %71, %72, %73 : vector<1x128xi1>, vector<1x128xf32>
    %75 = arith.addf %69, %74 : vector<1x128xf32>
    %c2_i32 = arith.constant 2 : i32
    %76 = vector.broadcast %c2_i32 : i32 to vector<1x128xi32>
    %77 = arith.cmpi eq, %64, %76 : vector<1x128xi32>
    %cst_24 = arith.constant 0.000000e+00 : f32
    %78 = vector.broadcast %63 : f32 to vector<1x128xf32>
    %79 = vector.broadcast %cst_24 : f32 to vector<1x128xf32>
    %80 = arith.select %77, %78, %79 : vector<1x128xi1>, vector<1x128xf32>
    %81 = arith.addf %75, %80 : vector<1x128xf32>
    %c0_25 = arith.constant 0 : index
    %c0_26 = arith.constant 0 : index
    %c0_27 = arith.constant 0 : index
    %c0_28 = arith.constant 0 : index
    %82 = vector.load %arg4[%c0_25, %c0_26, %c0_27, %c0_28] : memref<1x1x1x128xf32, #tpu.memory_space<vmem>>, vector<1x1x1x128xf32>
    %83 = vector.shape_cast %82 : vector<1x1x1x128xf32> to vector<1x128xf32>
    %84 = vector.shape_cast %81 : vector<1x128xf32> to vector<1x1x1x128xf32>
    tpu.vector_store %arg4[%c0_25, %c0_26, %c0_27, %c0_28], %84 {strides = array<i32>} : memref<1x1x1x128xf32, #tpu.memory_space<vmem>>, vector<1x1x1x128xf32>,
    return
  }
  func.func @transform_0(%arg0: i32, %arg1: i32) -> (i32, i32, i32) {
    %c0_i32 = arith.constant 0 : i32
    %c0_i32_0 = arith.constant 0 : i32
    return %arg0, %arg1, %c0_i32 : i32, i32, i32
  }
  func.func @transform_1(%arg0: i32, %arg1: i32) -> (i32, i32, i32) {
    %c0_i32 = arith.constant 0 : i32
    %c0_i32_0 = arith.constant 0 : i32
    return %arg0, %arg1, %c0_i32 : i32, i32, i32
  }
  func.func @transform_2(%arg0: i32, %arg1: i32) -> (i32, i32, i32, i32) {
    %c0_i32 = arith.constant 0 : i32
    %c0_i32_0 = arith.constant 0 : i32
    %c0_i32_1 = arith.constant 0 : i32
    return %arg0, %arg1, %c0_i32, %c0_i32_0 : i32, i32, i32, i32
  }
}

</mosaic_0001>

<bundles_post_ra>
// kernel: tpu_custom_call.1
= control target key start
LH: loop header
LB: loop body
LE: loop exit
PB: predicated region body
PF: predicated region fallthrough
CT: control target
= control target key end

     0   :  { %7 = vsyncpa [#allocation3], 0  ;;  %s955_s0 = inlined_call_operand.hbm [shape: bf16[2,8,256], index: 0, kind: input, shape index: {}]   ;;  %s956_s1 = inlined_call_operand.hbm [shape: f32[2,8,256], index: 1, kind: input, shape index: {}]   ;;  %s957_s2 = inlined_call_operand.hbm [shape: f32[2,1,1,128], index: 2, kind: output, shape index: {}]  }
   0x1   :  { %9 = vsyncpa [#allocation3 + $0x1], 0 }
   0x2   :  { %10 = vsyncpa [#allocation6], 0 }
   0x3   :  { %12 = vsyncpa [#allocation6 + $0x1], 0 }
   0x4   :  { %13 = vsyncpa [#allocation4], 0 }
   0x5   :  { %15 = vsyncpa [#allocation4 + $0x1], 0  ;;  %s729_s9 = smov 0   ;;  %s731_s10 = smov 0  }
   0x6   :  { %s733_s11 = smov 0   ;;  %s735_s12 = smov 0  }
   0x7   :  { %s737_s13 = smov 0   ;;  %s739_s14 = smov 0  }
   0x8 LB: > { %s456_s15 = sadd.s32 4294967295, %s708_s14   ;;  %s457_s16 = sadd.s32 4294967294, %s708_s14   ;;  %s708_s14 = sphi %s739_s14, %s21_s14   ;;  %s704_s13 = sphi %s737_s13, %s977_s13   ;;  %s700_s12 = sphi %s735_s12, %s976_s12   ;;  %s696_s11 = sphi %s733_s11, %s975_s11   ;;  %s692_s10 = sphi %s731_s10, %s974_s10   ;;  %s688_s9 = sphi %s729_s9, %s973_s9  }
   0x9   : > { %s33_s17 = sadd.s32 1, %s704_s13  ;;  %s42_s18 = sadd.s32 1, %s696_s11 }
   0xa   : > { %p35_p0 = scmp.ge.s32.totalorder %s33_s17, 2  ;;  %p49_p1 = scmp.ne.s32.totalorder %s696_s11, %s692_s10 }
   0xb   : > { %p50_p2 = scmp.eq.s32.totalorder %s708_s14, 0  ;;  %p55_p3 = scmp.ne.s32.totalorder %s692_s10, %s688_s9 }
   0xc   : > { %s979_s17 = smov (%p35_p0, %s33_s17), 0  ;;  %p56_p5 = scmp.eq.s32.totalorder %s456_s15, 0 }
   0xd   : > { %p770_p4 = por %p50_p2, %p49_p1  ;;  %s37_s20 = ssub.s32 %s704_s13, %s979_s17 }
   0xe   : > { %p109_p6 = scmp.eq.s32.totalorder %s456_s15, 1  ;;  %p40_p7 = scmp.eq.s32.totalorder %s37_s20, 0 }
   0xf   : > { %p776_p8 = por %p56_p5, %p55_p3  ;;  %p115_p10 = scmp.eq.s32.totalorder %s457_s16, 1 }
  0x10   : > { %p780_p9 = por %p109_p6, %p49_p1  ;;  %p499_p13 = scmp.lt.s32.totalorder %s708_s14, 2 }
  0x11   : > { %s961_s21 = scalar_select %p776_p8, 1, 0 }
  0x12   : > { %s962_s22 = scalar_select %p780_p9, 1, 0 }
  0x13   : > { %s785_s23 = scalar_select %p40_p7, %s696_s11, %s42_s18  }
  0x14   : > { %p787_p11 = por %p115_p10, %p55_p3  ;;  %s794_s25 = sand.u32 1, %s696_s11  }
  0x15   : > { %s460_s26 = sshll.u32 %s794_s25, 3  ;;  %s474_s27 = sshll.u32 %s704_s13, 7 }
  0x16   : > { %s963_s24 = scalar_select %p787_p11, 1, 0 }
  0x17   : > { %s801_s30 = scalar_lea.hbm %s955_s0, %s474_s27  ;;  %s139_s3 = scalar_lea.vmem [#allocation2], %s460_s26 }
  0x18   : > { %s149_s4 = sshll.u32 %s139_s3, 4  ;;  %p807_p0 = pnand %p499_p13, %p770_p4  ;;  %s803_s4 = int_to_ptr.vmem [resolvable:$true] %s149_s4 }
  0x19   : > { %s136_s6 = scalar_lea.sflag [#allocation3], %s794_s25  ;;  %s562_s7 = scalar_lea.hbm %s801_s30, 128 }
  0x1a   : > { %p563_p3 = scmp.ne.s32.totalorder %s801_s30, %s562_s7  ;;  %p564_p5 = pneg %p807_p0 }
  0x1b   : > { %s567_s16 = scalar_lea.hbm %s955_s0, 256  ;;  %p568_p4 = scmp.lt.u32.totalorder %s801_s30, %s955_s0 }
  0x1c   : > { %p565_p6 = pnand %p564_p5, %p563_p3  ;;  %p569_p10 = scmp.lt.u32.totalorder %s567_s16, %s562_s7 }
  0x1d   : > { %p571_p12 = scmp.lt.u32.totalorder %s562_s7, %s801_s30 }
  0x1e   : > { %p566_p7 = pneg %p565_p6  ;;  %p570_p13 = por %p569_p10, %p568_p4 }
  0x20   : > { %p572_p1 = por %p571_p12, %p570_p13 }
  0x22   : > { %p573_p2 = pnand %p572_p1, %p566_p7 }
  0x24   : > { %576 = shalt.err (!%p573_p2)
}
  0x25   : > { %s577_s20 = scalar_lea.vmem %s803_s4, 128  ;;  %s710_s26 = smov [#allocation2]  }
  0x26   : > { %p578_p3 = scmp.ne.s32.totalorder %s803_s4, %s577_s20  ;;  %s582_s27 = sshll.u32 %s710_s26, 4  ;;  %s583_s27 = int_to_ptr.vmem [resolvable:$false] %s582_s27 }
  0x27   : > { %s584_s28 = scalar_lea.vmem %s583_s27, 256  ;;  %p585_p9 = scmp.lt.s32.totalorder %s803_s4, %s583_s27 }
  0x28   : > { %p580_p6 = pnand %p578_p3, %p564_p5  ;;  %p586_p4 = scmp.lt.s32.totalorder %s584_s28, %s577_s20 }
  0x2a   : > { %p581_p11 = pneg %p580_p6  ;;  %p587_p10 = por %p586_p4, %p585_p9 }
  0x2c   : > { %p588_p12 = pnand %p587_p10, %p581_p11 }
  0x2e   : > { %591 = shalt.err (!%p588_p12)
}
  0x2f   : > { %491 = dma.hbm_to_vmem [thread:$0]  (!%p807_p0), %s801_s30, 128, %s803_s4, %s136_s6  }
  0x30   : > { %p965_p1 = scmp.lt.s32.totalorder %s708_s14, 3  ;;  %p966_p2 = scmp.ge.s32.totalorder %s708_s14, 1 }
  0x31   : > { %s463_s3 = sshll.u32 %s794_s25, 4  ;;  %s475_s7 = sshll.u32 %s704_s13, 8 }
  0x32   : > { %p843_p7 = pnand %p966_p2, %p965_p1  ;;  %s852_s16 = scalar_lea.hbm %s956_s1, %s475_s7 }
  0x33   : > { %s160_s18 = scalar_lea.vmem [#allocation5], %s463_s3  ;;  %s157_s30 = scalar_lea.sflag [#allocation6], %s794_s25 }
  0x34   : > { %s967_s29 = scalar_select %p843_p7, 1, 0 }
  0x35   : > { %s170_s19 = sshll.u32 %s160_s18, 4  ;;  %s592_s4 = scalar_lea.hbm %s852_s16, 256  ;;  %s171_s19 = int_to_ptr.vmem [resolvable:$true] %s170_s19 }
  0x36   : > { %p593_p9 = scmp.ne.s32.totalorder %s852_s16, %s592_s4  ;;  %s597_s26 = scalar_lea.hbm %s956_s1, 512 }
  0x37   : > { %p598_p3 = scmp.lt.u32.totalorder %s852_s16, %s956_s1  ;;  %p599_p6 = scmp.lt.u32.totalorder %s597_s26, %s592_s4 }
  0x38   : > { %p595_p11 = pnand %p593_p9, %p564_p5  ;;  %p601_p10 = scmp.lt.u32.totalorder %s592_s4, %s852_s16 }
  0x39   : > { %p600_p4 = por %p599_p6, %p598_p3 }
  0x3a   : > { %p596_p13 = pneg %p595_p11 }
  0x3b   : > { %p602_p12 = por %p601_p10, %p600_p4 }
  0x3d   : > { %p603_p1 = pnand %p602_p12, %p596_p13 }
  0x3f   : > { %606 = shalt.err (!%p603_p1)
}
  0x40   : > { %s607_s25 = scalar_lea.vmem %s171_s19, 256  ;;  %s711_s3 = smov [#allocation5]  }
  0x41   : > { %p608_p2 = scmp.ne.s32.totalorder %s171_s19, %s607_s25  ;;  %s612_s7 = sshll.u32 %s711_s3, 4  ;;  %s613_s7 = int_to_ptr.vmem [resolvable:$false] %s612_s7 }
  0x42   : > { %s614_s8 = scalar_lea.vmem %s613_s7, 512  ;;  %p615_p8 = scmp.lt.s32.totalorder %s171_s19, %s613_s7 }
  0x43   : > { %p610_p9 = pnand %p608_p2, %p564_p5  ;;  %p616_p7 = scmp.lt.s32.totalorder %s614_s8, %s607_s25 }
  0x45   : > { %p611_p11 = pneg %p610_p9  ;;  %p617_p3 = por %p616_p7, %p615_p8 }
  0x47   : > { %p618_p6 = pnand %p617_p3, %p611_p11 }
  0x49   : > { %621 = shalt.err (!%p618_p6)
}
  0x4a   : > { %494 = dma.hbm_to_vmem [thread:$0]  (!%p807_p0), %s852_s16, 256, %s171_s19, %s157_s30  }
  0x4b   : > { %p968_p13 = scmp.ne.s32.totalorder %s967_s29, 0 }
  0x4c   : > { %s877_s15 = sand.u32 (!%p968_p13), 1, %s692_s10   ;;  %p969_p5 = scmp.ne.s32.totalorder (!%p968_p13), %s961_s21, 0 }
  0x4d   : > { %179 = sbr.rel (%p968_p13) target bundleno = 384 (0x180), region = 28  ;;  %s467_s18 = sshll.u32 (!%p968_p13), %s877_s15, 3 }
  0x4e   : > { %s182_s4 = scalar_lea.sflag (!%p968_p13), [#allocation3], %s877_s15  ;;  %s185_s6 = scalar_lea.vmem (!%p968_p13), [#allocation2], %s467_s18 }
  0x54   : > { %675 = dma.done.wait (%p969_p5), %s182_s4, 128  }
  0x55   : > { %677 = vsyncadd (%p969_p5), %s182_s4, 4294967168  ;;  %s468_s5 = sshll.u32 %s877_s15, 4  ;;  %s191_s29 = scalar_lea.sflag [#allocation6], %s877_s15 }
  0x56   : > { %s194_s16 = scalar_lea.vmem [#allocation5], %s468_s5 }
  0x57   : > { %679 = dma.done.wait (%p969_p5), %s191_s29, 256  }
  0x58   : > { %681 = vsyncadd (%p969_p5), %s191_s29, 4294967040  ;;  %v222_v0 = vld [vmem:[%s194_s16] sm:$0xff]  ;;  %v223_v1 = vld [vmem:[%s194_s16 + $0x8] sm:$0xff]  ;;  %v712_v3 = vmov 0.0   ;;  %s471_s20 = sshll.u32 %s700_s12, 4  ;;  %s218_s26 = scalar_lea.vmem [#allocation7], %s877_s15 }
  0x59   : > { %v219_v2 = vld [vmem:[%s185_s6] sm:$0xff]  ;;  %vm264_vm0 = vcmp.eq.f32.partialorder %v222_v0, 1.0  ;;  %vm265_vm1 = vcmp.eq.f32.partialorder %v223_v1, 1.0  ;;  %v270_v43 = vsub.f32 1.0, %v222_v0  ;;  %v271_v45 = vsub.f32 1.0, %v223_v1  ;;  %s352_s27 = sshll.u32 %s218_s26, 4  ;;  %s906_s3 = scalar_lea.hbm %s957_s2, %s471_s20  ;;  %s908_s27 = int_to_ptr.vmem [resolvable:$true] %s352_s27 }
  0x5a   : > { %v891_v4 = vsel %vm264_vm0, 1.0, %v712_v3  ;;  %v893_v5 = vsel %vm265_vm1, 1.0, %v712_v3  ;;  %v220_v6 = vunpack.c.l.bf16 %v219_v2  ;;  %v221_v7 = vunpack.c.h.bf16 %v219_v2  ;;  %s339_s7 = scalar_lea.sflag [#allocation4], %s877_s15  ;;  %s622_s8 = scalar_lea.vmem %s908_s27, 16 }
  0x5b   : > { %v314_v8 = vadd.f32 %v893_v5, %v891_v4  ;;  %v272_v47 = vmul.f32 %v270_v43, %v270_v43  ;;  %v273_v49 = vmul.f32 %v271_v45, %v271_v45  ;;  %v291_v61 = vsub.f32 1.0, %v893_v5  ;;  %p623_p8 = scmp.ne.s32.totalorder %s908_s27, %s622_s8  ;;  %p970_p0 = scmp.ne.s32.totalorder %s962_s22, 0 }
  0x5c   : > { %v224_v9 = vand.u32 2147483647, %v220_v6  ;;  %v225_v10 = vand.u32 2147483647, %v221_v7  ;;  %v238_v19 = vsub.f32 0.0, %v220_v6  ;;  %v239_v20 = vsub.f32 0.0, %v221_v7 }
  0x5d   : > { %315 = vadd.xlane.f32.xlu1 %v314_v8  ;;  %v244_v29 = vmax.f32 %v220_v6, 0.0  ;;  %v245_v30 = vmax.f32 %v221_v7, 0.0  ;;  %v274_v53 = vmul.f32 %v272_v47, %v272_v47  ;;  %v275_v56 = vmul.f32 %v273_v49, %v273_v49  ;;  %p624_p7 = pnand %p623_p8, %p970_p0  ;;  %s713_s12 = smov [#allocation7]  }
  0x5e   : > { %v226_v11 = vsub.f32 0.0, %v224_v9  ;;  %v227_v12 = vsub.f32 0.0, %v225_v10  ;;  %v240_v21 = vmax.f32 %v238_v19, 0.0  ;;  %v241_v23 = vmax.f32 %v239_v20, 0.0  ;;  %s626_s18 = sshll.u32 %s713_s12, 4  ;;  %s627_s18 = int_to_ptr.vmem [resolvable:$false] %s626_s18 }
  0x5f   : > { %v290_v62 = vsub.f32 1.0, %v891_v4  ;;  %p625_p4 = pneg %p624_p7  ;;  %s628_s4 = scalar_lea.vmem %s627_s18, 32 }
  0x60   : > { %v228_v13 = vmul.f32 1.442695, %v226_v11  ;;  %v230_v14 = vmul.f32 1.442695, %v227_v12  ;;  %p629_p10 = scmp.lt.s32.totalorder %s908_s27, %s627_s18  ;;  %p630_p12 = scmp.lt.s32.totalorder %s628_s4, %s622_s8 }
  0x62   : > { %550 = vpow2.f32 %v228_v13  ;;  %p631_p1 = por %p630_p12, %p629_p10 }
  0x63   : > { %552 = vpow2.f32 %v230_v14 }
  0x64   : > { %p632_p2 = pnand %p631_p1, %p625_p4 }
  0x6c   : > { %v551_v15 = vpop.eup %550 }
  0x6d   : > { %v553_v16 = vpop.eup %552  ;;  %v232_v17 = vadd.f32 1.0, %v551_v15 }
  0x6e   : > { %v233_v18 = vadd.f32 1.0, %v553_v16 }
  0x6f   : > { %554 = vlog2.f32 %v232_v17 }
  0x70   : > { %556 = vlog2.f32 %v233_v18 }
  0x79   : > { %v555_v22 = vpop.eup %554 }
  0x7a   : > { %v557_v24 = vpop.eup %556  ;;  %v235_v25 = vmul.f32 0.6931472, %v555_v22 }
  0x7b   : > { %v237_v26 = vmul.f32 0.6931472, %v557_v24 }
  0x7c   : > { %v242_v27 = vadd.f32 %v240_v21, %v235_v25  ;;  %v246_v34 = vadd.f32 %v244_v29, %v235_v25 }
  0x7d   : > { %v243_v28 = vadd.f32 %v241_v23, %v237_v26  ;;  %v247_v36 = vadd.f32 %v245_v30, %v237_v26 }
  0x7e   : > { %v248_v31 = vsub.f32 0.0, %v242_v27  ;;  %v254_v40 = vsub.f32 0.0, %v246_v34 }
  0x7f   : > { %v249_v32 = vsub.f32 0.0, %v243_v28  ;;  %v255_v42 = vsub.f32 0.0, %v247_v36 }
  0x80   : > { %v250_v33 = vmax.f32 %v248_v31, -9.2103405  ;;  %v256_v44 = vmax.f32 %v254_v40, -9.2103405 }
  0x81   : > { %v251_v35 = vmax.f32 %v249_v32, -9.2103405  ;;  %v257_v46 = vmax.f32 %v255_v42, -9.2103405  ;;  %v324_v32 = vlaneseq }
  0x82   : > { %v252_v37 = vmin.f32 %v250_v33, -0.000100005  ;;  %v258_v48 = vmin.f32 %v256_v44, -0.000100005 }
  0x83   : > { %v253_v38 = vmin.f32 %v251_v35, -0.000100005  ;;  %v259_v50 = vmin.f32 %v257_v46, -0.000100005  ;;  %v325_v33 = vand.u32 127, %v324_v32 }
  0x84   : > { %v260_v39 = vmul.f32 1.442695, %v252_v37 }
  0x85   : > { %v262_v41 = vmul.f32 1.442695, %v253_v38  ;;  %vm326_vm2 = vcmp.eq.s32.totalorder %v325_v33, 0  ;;  %vm329_vm3 = vcmp.eq.s32.totalorder %v325_v33, 1  ;;  %vm333_vm4 = vcmp.eq.s32.totalorder %v325_v33, 2 }
  0x86   : > { %558 = vpow2.f32 %v260_v39 }
  0x87   : > { %560 = vpow2.f32 %v262_v41 }
  0x90   : > { %v559_v51 = vpop.eup %558 }
  0x91   : > { %v561_v52 = vpop.eup %560  ;;  %v276_v54 = vsub.f32 1.0, %v559_v51  ;;  %v284_v55 = vmul.f32 %v559_v51, %v258_v48 }
  0x92   : > { %v277_v57 = vsub.f32 1.0, %v561_v52  ;;  %v285_v58 = vmul.f32 %v561_v52, %v259_v50 }
  0x93   : > { %v278_v59 = vmul.f32 %v276_v54, %v276_v54  ;;  %v286_v60 = vmul.f32 %v559_v51, %v284_v55 }
  0x94   : > { %v279_v63 = vmul.f32 %v277_v57, %v277_v57  ;;  %v287_v0 = vmul.f32 %v561_v52, %v285_v58 }
  0x95   : > { %v280_v1 = vmul.f32 %v278_v59, %v252_v37  ;;  %v288_v2 = vmul.f32 %v286_v60, %v274_v53 }
  0x96   : > { %v281_v3 = vmul.f32 %v279_v63, %v253_v38  ;;  %v289_v6 = vmul.f32 %v287_v0, %v275_v56 }
  0x97   : > { %v282_v7 = vmul.f32 %v891_v4, %v280_v1  ;;  %v292_v9 = vmul.f32 %v290_v62, %v288_v2 }
  0x98   : > { %v283_v8 = vmul.f32 %v893_v5, %v281_v3  ;;  %v293_v10 = vmul.f32 %v291_v61, %v289_v6 }
  0x9a   : > { %v294_v11 = vadd.f32 %v283_v8, %v282_v7  ;;  %v304_v12 = vadd.f32 %v293_v10, %v292_v9 }
  0x9c   : > { %295 = vadd.xlane.f32.xlu0 %v294_v11 }
  0xa0   : > { %305 = vadd.xlane.f32.xlu0 %v304_v12 }
  0xea   : > { %v316_v13 = vpop.xlane.xlu1 %315 }
  0xeb   : > { %v317_v14 = vrot.slane %v316_v13, 4 }
  0xed   : > { %v318_v15 = vadd.f32 %v317_v14, %v316_v13 }
  0xef   : > { %v319_v19 = vrot.slane %v318_v15, 2 }
  0xf1   : > { %v320_v24 = vadd.f32 %v319_v19, %v318_v15 }
  0xf3   : > { %v321_v28 = vrot.slane %v320_v24, 1 }
  0xf5   : > { %v322_v31 = vadd.f32 %v321_v28, %v320_v24 }
 0x129   : > { %v296_v16 = vpop.xlane.xlu0 %295 }
 0x12a   : > { %v297_v17 = vrot.slane %v296_v16, 4 }
 0x12c   : > { %v298_v18 = vadd.f32 %v297_v17, %v296_v16 }
 0x12d   : > { %v306_v20 = vpop.xlane.xlu0 %305 }
 0x12e   : > { %v299_v21 = vrot.slane %v298_v18, 2  ;;  %v307_v22 = vrot.slane %v306_v20, 4 }
 0x130   : > { %v308_v23 = vadd.f32 %v307_v22, %v306_v20  ;;  %v300_v4 = vadd.f32 %v299_v21, %v298_v18 }
 0x132   : > { %v309_v5 = vrot.slane %v308_v23, 2  ;;  %v301_v25 = vrot.slane %v300_v4, 1 }
 0x134   : > { %v310_v26 = vadd.f32 %v309_v5, %v308_v23  ;;  %v302_v27 = vadd.f32 %v301_v25, %v300_v4 }
 0x136   : > { %476 = vpush %v302_v27  ;;  %v311_v29 = vrot.slane %v310_v26, 1 }
 0x138   : > { %v312_v30 = vadd.f32 %v311_v29, %v310_v26 }
 0x13a   : > { %478 = vpush %v312_v30 }
 0x13b   : > { %480 = vpush %v322_v31 }
 0x167   : > { %s477_s21 = spop %476 }
 0x168   : > { %v327_v34 = vstv %s477_s21 }
 0x169   : > { %v328_v36 = vsel %vm326_vm2, %v327_v34, 0.0 }
 0x16b   : > { %s479_s19 = spop %478 }
 0x16c   : > { %v330_v35 = vstv %s479_s19  ;;  %s481_s30 = spop %480 }
 0x16d   : > { %v331_v37 = vsel %vm329_vm3, %v330_v35, 0.0  ;;  %v334_v38 = vstv %s481_s30 }
 0x16e   : > { %v332_v39 = vadd.f32 %v331_v37, %v328_v36  ;;  %v335_v40 = vsel %vm333_vm4, %v334_v38, 0.0 }
 0x170   : > { %v336_v41 = vadd.f32 %v335_v40, %v332_v39 }
 0x172   : > { %337 = vst [vmem:[%s218_s26] sm:$0x1] %v336_v41 }
 0x173   : > { %635 = shalt.err (!%p632_p2)
}
 0x174   : > { %s636_s15 = scalar_lea.hbm %s906_s3, 16  ;;  %s640_s29 = scalar_lea.hbm %s957_s2, 32 }
 0x175   : > { %p637_p9 = scmp.ne.s32.totalorder %s906_s3, %s636_s15  ;;  %p641_p6 = scmp.lt.u32.totalorder %s906_s3, %s957_s2 }
 0x176   : > { %p642_p13 = scmp.lt.u32.totalorder %s640_s29, %s636_s15  ;;  %p644_p8 = scmp.lt.u32.totalorder %s636_s15, %s906_s3 }
 0x177   : > { %p638_p11 = pnand %p637_p9, %p970_p0 }
 0x178   : > { %p643_p5 = por %p642_p13, %p641_p6 }
 0x179   : > { %p639_p3 = pneg %p638_p11 }
 0x17a   : > { %p645_p7 = por %p644_p8, %p643_p5 }
 0x17c   : > { %p646_p4 = pnand %p645_p7, %p639_p3 }
 0x17e   : > { %649 = shalt.err (!%p646_p4)
}
 0x17f   : > { %486 = dma.vmem_to_hbm [thread:$0]  (%p970_p0), %s908_s27, 16, %s906_s3, %s339_s7  }
 0x180 PF: > { %s364_s19 = sand.u32 1, %s688_s9   ;;  %p971_p10 = scmp.ne.s32.totalorder %s963_s24, 0 }
 0x181   : > { %p972_p12 = scmp.ge.s32.totalorder %s708_s14, 2  ;;  %s365_s30 = scalar_lea.sflag [#allocation4], %s364_s19 }
 0x183   : > { %p496_p1 = pnand %p972_p12, %p971_p10 }
 0x185   : > { %683 = dma.done.wait (!%p496_p1), %s365_s30, 16  }
 0x186   : > { %685 = vsyncadd (!%p496_p1), %s365_s30, 4294967280  ;;  %s21_s14 = sadd.s32 1, %s708_s14   ;;  %s973_s9 = smov %s692_s10 }
 0x187   : > { %p18_p2 = scmp.ge.s32.totalorder %s21_s14, 4   ;;  %s974_s10 = smov %s696_s11 }
 0x188   : > { %s975_s11 = smov %s785_s23  ;;  %s976_s12 = smov %s704_s13 }
 0x189   : > { %s977_s13 = smov %s979_s17  ;;  %20 = sbr.rel (!%p18_p2) target bundleno = 8 (0x8), region = 86 }
 0x190   :  { %369 = vsyncpa [#allocation3], 1 }
 0x191   :  { %371 = vsyncpa [#allocation3 + $0x1], 1 }
 0x192   :  { %372 = vsyncpa [#allocation6], 1 }
 0x193   :  { %374 = vsyncpa [#allocation6 + $0x1], 1 }
 0x194   :  { %375 = vsyncpa [#allocation4], 1 }
 0x195   :  { %377 = vsyncpa [#allocation4 + $0x1], 1 }

</bundles_post_ra>
